<compile_context>
chip_gen: v7x
topology: tpu7x:2x2x1
jax: 0.10.0
libtpu: 0.0.40
codegen_flags: <defaults>
</compile_context>

<pallas_src>
import functools

import jax
import jax.numpy as jnp
from jax.experimental import pallas as pl
from jax.experimental.pallas import tpu as pltpu


_NEG_INF = -1e30  # bias for padded logit lanes: exp(-1e30 - max) == 0 exactly


def _round_up(x, m):
    return -(-x // m) * m


# ----------------------------------------------------------------------------
# Kernel
# ----------------------------------------------------------------------------
def _critic_kernel(s_ref, a_ref,
                   w1s_ref, w1a_ref, b1_ref,
                   w2_ref, b2_ref,
                   w3_ref, b3_ref,
                   out_ref,
                   *, head_lanes, apply_softmax):
    """Fused twin-head MLP for one batch tile.

    Layer 1:  sa @ [w1 || w4]          (state/action row-split -> no concat)
    Layer 2:  block_diag(w2, w5)
    Layer 3:  block_diag(w3, w6) -> logits = [q1 || q2], each head padded to
              `head_lanes` (multiple of 128) lanes so stores are unmasked.

    Matmul operands bf16, accumulation f32, elementwise math f32.
    """
    s = s_ref[...]          # bf16 (cast in wrapper)
    a = a_ref[...]          # bf16

    # ---- layer 1 (both heads) ----
    h = (jnp.dot(s, w1s_ref[...], preferred_element_type=jnp.float32)
         + jnp.dot(a, w1a_ref[...], preferred_element_type=jnp.float32)
         + b1_ref[...])
    h = jnp.maximum(h, 0.0).astype(jnp.bfloat16)

    # ---- layer 2 (block-diagonal: heads stay independent) ----
    h = jnp.dot(h, w2_ref[...], preferred_element_type=jnp.float32) + b2_ref[...]
    h = jnp.maximum(h, 0.0).astype(jnp.bfloat16)

    # ---- layer 3 (block-diagonal) -> [tile_b, 2 * head_lanes] ----
    logits = jnp.dot(h, w3_ref[...], preferred_element_type=jnp.float32) + b3_ref[...]

    if apply_softmax:
        # Per-head softmax epilogue.  Padded lanes carry a -1e30 bias so
        # exp() kills them; slices below are 128-lane aligned.  Divide goes
        # to the EUP via approx reciprocal; results are written straight
        # into the output slab (no concatenate).
        for head in range(2):
            lo, hi = head * head_lanes, (head + 1) * head_lanes
            q = logits[:, lo:hi]
            e = jnp.exp(q - jnp.max(q, axis=-1, keepdims=True))
            inv = pl.reciprocal(jnp.sum(e, axis=-1, keepdims=True), approx=True)
            out_ref[:, lo:hi] = (e * inv).astype(out_ref.dtype)
    else:
        out_ref[...] = logits.astype(out_ref.dtype)


# ----------------------------------------------------------------------------
# Wrapper
# ----------------------------------------------------------------------------
_PIN_SINGLE_BUFFER_OK = None  # lazily discovered: is pipeline_mode=Buffered(1) supported?


def _batch_map(i):
    return (i, 0)


def _pin_map(i):
    # Weights/biases: same block every grid step -> stay VMEM-resident.
    return (0, 0)


def _pinned_spec(shape, single_buffer):
    if single_buffer:
        # Constant block index -> one buffer suffices; halves pinned weight VMEM.
        return pl.BlockSpec(shape, _pin_map, pipeline_mode=pl.Buffered(1))
    return pl.BlockSpec(shape, _pin_map)


def _critic_call(state, action, packed, *, apply_softmax, block_b=1024,
                 out_dtype=jnp.float32, vmem_limit_bytes=None):
    global _PIN_SINGLE_BUFFER_OK

    B, sd = state.shape
    ad = action.shape[1]
    h1 = packed["b14"].shape[1]          # 2 * hidden_dims[0]
    h2 = packed["b25"].shape[1]          # 2 * hidden_dims[1]
    out_w = packed["b36"].shape[1]       # 2 * head_lanes
    head_lanes = out_w // 2
    n_atoms = int(packed["n_atoms"])

    # Batch tile: multiple of 16 rows (bf16 sublane packing).  Per generation:
    #   v5e/v6e (1 TC, 128 MiB VMEM): block_b 2048-4096, single big tile.
    #   v7x     (2 TC,  64 MiB VMEM): cap block_b so the grid has >= 2 steps.
    tile_b = min(_round_up(block_b, 16), _round_up(max(B, 1), 16))
    Bp = _round_up(B, tile_b)

    # bf16 inputs: halves streamed HBM bytes; pad batch after the cast.
    state = state.astype(jnp.bfloat16)
    action = action.astype(jnp.bfloat16)
    if Bp != B:
        pad = ((0, Bp - B), (0, 0))
        state = jnp.pad(state, pad)
        action = jnp.pad(action, pad)

    grid = (Bp // tile_b,)
    kernel = functools.partial(_critic_kernel, head_lanes=head_lanes,
                               apply_softmax=apply_softmax)

    def run(single_buffer):
        cp = dict(dimension_semantics=("parallel",))
        if vmem_limit_bytes is not None:
            cp["vmem_limit_bytes"] = vmem_limit_bytes
        return pl.pallas_call(
            kernel,
            out_shape=jax.ShapeDtypeStruct((Bp, out_w), out_dtype),
            grid=grid,
            in_specs=[
                pl.BlockSpec((tile_b, sd), _batch_map),        # state tile
                pl.BlockSpec((tile_b, ad), _batch_map),        # action tile
                _pinned_spec((sd, h1), single_buffer),         # w14 (state rows)
                _pinned_spec((ad, h1), single_buffer),         # w14 (action rows)
                _pinned_spec((1, h1), single_buffer),          # b14
                _pinned_spec((h1, h2), single_buffer),         # w25 (block-diag)
                _pinned_spec((1, h2), single_buffer),          # b25
                _pinned_spec((h2, out_w), single_buffer),      # w36 (block-diag)
                _pinned_spec((1, out_w), single_buffer),       # b36
            ],
            out_specs=pl.BlockSpec((tile_b, out_w), _batch_map),
            compiler_params=pltpu.CompilerParams(**cp),
        )(state, action,
          packed["w14s"], packed["w14a"], packed["b14"],
          packed["w25"], packed["b25"],
          packed["w36"], packed["b36"])

    if _PIN_SINGLE_BUFFER_OK is None:
        try:
            out = run(single_buffer=True)
            _PIN_SINGLE_BUFFER_OK = True
        except Exception:  # older jax without pipeline_mode on pallas_call specs
            _PIN_SINGLE_BUFFER_OK = False
            out = run(single_buffer=False)
    else:
        out = run(single_buffer=_PIN_SINGLE_BUFFER_OK)

    q1 = out[:B, :n_atoms]
    q2 = out[:B, head_lanes:head_lanes + n_atoms]
    return q1, q2


def critic_forward(state, action, packed_params, block_b=1024,
                   vmem_limit_bytes=None):
    """Pallas-backed equivalent of Critic.forward -> (q1_logits, q2_logits)."""
    return _critic_call(state, action, packed_params, apply_softmax=False,
                        block_b=block_b, vmem_limit_bytes=vmem_limit_bytes)


def critic_get_probs(state, action, packed_params, block_b=1024,
                     vmem_limit_bytes=None):
    """Pallas-backed equivalent of Critic.get_probs (softmax fused in-kernel)."""
    return _critic_call(state, action, packed_params, apply_softmax=True,
                        block_b=block_b, vmem_limit_bytes=vmem_limit_bytes)


# ----------------------------------------------------------------------------
# Parameter init / packing
# ----------------------------------------------------------------------------
def pack_critic_params(raw, state_dim, compute_dtype=jnp.bfloat16):
    """Fuse the two heads' per-layer weights for the kernel.

    Layer 1: columns concatenated  [in, 2*H0]   (row-split into state/action)
    Layer 2: block-diagonal        [2*H0, 2*H1]
    Layer 3: block-diagonal        [2*H1, 2*head_lanes], head_lanes = n_atoms
             zero-padded up to a multiple of 128 lanes (padded bias = -1e30
             so the fused softmax ignores those lanes).
    Weights bf16 (MXU-native); biases f32 (added after f32 accumulation).
    """
    H0 = raw["w1"].shape[1]
    H1 = raw["w2"].shape[1]
    n_atoms = raw["w3"].shape[1]
    head_lanes = _round_up(n_atoms, 128)   # lane-dense per-head output width
    pad_c = head_lanes - n_atoms

    w14 = jnp.concatenate([raw["w1"], raw["w4"]], axis=1)          # [in, 2*H0]
    b14 = jnp.concatenate([raw["b1"], raw["b4"]], axis=1)

    z25 = jnp.zeros((H0, H1), jnp.float32)
    w25 = jnp.block([[raw["w2"], z25], [z25, raw["w5"]]])          # [2*H0, 2*H1]
    b25 = jnp.concatenate([raw["b2"], raw["b5"]], axis=1)

    def pad_w(w):
        return jnp.pad(w, ((0, 0), (0, pad_c)))

    def pad_b(b):
        return jnp.pad(b, ((0, 0), (0, pad_c)), constant_values=_NEG_INF)

    w3p, w6p = pad_w(raw["w3"]), pad_w(raw["w6"])
    b3p, b6p = pad_b(raw["b3"]), pad_b(raw["b6"])
    z36 = jnp.zeros((H1, head_lanes), jnp.float32)
    w36 = jnp.block([[w3p, z36], [z36, w6p]])                      # [2*H1, 2*A_pad]
    b36 = jnp.concatenate([b3p, b6p], axis=1)
    # TODO(synk): for hidden_dims >= ~256 store layers 2/3 per-head (two dots in
    # the kernel) instead of block-diagonal to halve MXU work and weight VMEM.

    return {
        "w14s": w14[:state_dim].astype(compute_dtype),
        "w14a": w14[state_dim:].astype(compute_dtype),
        "b14": b14.astype(jnp.float32),
        "w25": w25.astype(compute_dtype),
        "b25": b25.astype(jnp.float32),
        "w36": w36.astype(compute_dtype),
        "b36": b36.astype(jnp.float32),
        "n_atoms": n_atoms,
    }


def init_critic_params(key, state_dim, action_dim, hidden_dims, n_atoms):
    """PyTorch-style uniform(+-1/sqrt(fan_in)) init.

    Returns (raw_params_f32, packed_params) — raw for reference checking,
    packed (head-fused, lane-padded, bf16) for the kernel.
    Weights are stored [in, out] so the math is x @ W + b.
    """
    in_dim = state_dim + action_dim
    layer_dims = [
        (in_dim, hidden_dims[0]),          # l1
        (hidden_dims[0], hidden_dims[1]),  # l2
        (hidden_dims[1], n_atoms),         # l3
        (in_dim, hidden_dims[0]),          # l4
        (hidden_dims[0], hidden_dims[1]),  # l5
        (hidden_dims[1], n_atoms),         # l6
    ]
    raw = {}
    keys = jax.random.split(key, 2 * len(layer_dims))
    for i, (fan_in, fan_out) in enumerate(layer_dims):
        bound = float(fan_in) ** -0.5
        raw[f"w{i+1}"] = jax.random.uniform(
            keys[2 * i], (fan_in, fan_out), jnp.float32, -bound, bound)
        raw[f"b{i+1}"] = jax.random.uniform(
            keys[2 * i + 1], (1, fan_out), jnp.float32, -bound, bound)
    packed = pack_critic_params(raw, state_dim)
    return raw, packed


# ----------------------------------------------------------------------------
# Pure-JAX reference (f32, un-fused) for correctness checking
# ----------------------------------------------------------------------------
def _reference_forward(state, action, raw):
    sa = jnp.concatenate([state, action], axis=1)

    def head(w_a, b_a, w_b, b_b, w_c, b_c):
        h = jax.nn.relu(sa @ w_a + b_a)
        h = jax.nn.relu(h @ w_b + b_b)
        return h @ w_c + b_c

    q1 = head(raw["w1"], raw["b1"], raw["w2"], raw["b2"], raw["w3"], raw["b3"])
    q2 = head(raw["w4"], raw["b4"], raw["w5"], raw["b5"], raw["w6"], raw["b6"])
    return q1, q2


# ----------------------------------------------------------------------------
# Demo / self-test
# ----------------------------------------------------------------------------
if __name__ == "__main__":
    batch = 2
    state_dim = 8
    action_dim = 4
    hidden_dims = [32, 32]
    n_atoms = 16
    v_min, v_max = -10.0, 10.0
    # TODO(synk): `support = linspace(v_min, v_max, n_atoms)` is a constant
    # buffer unused by forward/get_probs; keep it in plain JAX if needed.
    support = jnp.linspace(v_min, v_max, n_atoms)

    key = jax.random.PRNGKey(0)
    k_params, k_state, k_action = jax.random.split(key, 3)

    raw_params, packed_params = init_critic_params(
        k_params, state_dim, action_dim, hidden_dims, n_atoms)
    state = jax.random.normal(k_state, (batch, state_dim), jnp.float32)
    action = jax.random.normal(k_action, (batch, action_dim), jnp.float32)

    # Forward (logits).
    q1_logits, q2_logits = critic_forward(state, action, packed_params)
    jax.block_until_ready((q1_logits, q2_logits))

    q1_ref, q2_ref = _reference_forward(state, action, raw_params)
    assert q1_logits.shape == (batch, n_atoms)
    assert q2_logits.shape == (batch, n_atoms)
    # bf16 matmul operands (f32 accumulate) -> relaxed tolerance vs. f32 ref.
    assert jnp.allclose(q1_logits, q1_ref, atol=5e-2, rtol=5e-2)
    assert jnp.allclose(q2_logits, q2_ref, atol=5e-2, rtol=5e-2)

    # get_probs (softmax fused in the kernel epilogue, approx reciprocal).
    p1, p2 = critic_get_probs(state, action, packed_params)
    jax.block_until_ready((p1, p2))
    assert jnp.allclose(jnp.sum(p1, axis=-1), 1.0, atol=1e-2)
    assert jnp.allclose(jnp.sum(p2, axis=-1), 1.0, atol=1e-2)
    assert jnp.allclose(p1, jax.nn.softmax(q1_ref, axis=-1), atol=5e-2, rtol=5e-2)
    assert jnp.allclose(p2, jax.nn.softmax(q2_ref, axis=-1), atol=5e-2, rtol=5e-2)

    # Exercise the multi-step grid + batch-padding path with an odd batch.
    kb_s, kb_a = jax.random.split(jax.random.PRNGKey(1))
    state_b = jax.random.normal(kb_s, (37, state_dim), jnp.float32)
    action_b = jax.random.normal(kb_a, (37, action_dim), jnp.float32)
    qb1, qb2 = critic_forward(state_b, action_b, packed_params, block_b=16)
    jax.block_until_ready((qb1, qb2))
    rb1, rb2 = _reference_forward(state_b, action_b, raw_params)
    assert qb1.shape == (37, n_atoms) and qb2.shape == (37, n_atoms)
    assert jnp.allclose(qb1, rb1, atol=5e-2, rtol=5e-2)
    assert jnp.allclose(qb2, rb2, atol=5e-2, rtol=5e-2)

    print("KERNEL_OK")
</pallas_src>

<mosaic_0001>
module attributes {stable_mosaic.version = 11 : i64} {
  func.func @_critic_kernel(%arg0: i32, %arg1: memref<16x8xbf16, #tpu.memory_space<vmem>>, %arg2: memref<16x4xbf16, #tpu.memory_space<vmem>>, %arg3: memref<8x64xbf16, #tpu.memory_space<vmem>>, %arg4: memref<4x64xbf16, #tpu.memory_space<vmem>>, %arg5: memref<1x64xf32, #tpu.memory_space<vmem>>, %arg6: memref<64x64xbf16, #tpu.memory_space<vmem>>, %arg7: memref<1x64xf32, #tpu.memory_space<vmem>>, %arg8: memref<64x256xbf16, #tpu.memory_space<vmem>>, %arg9: memref<1x256xf32, #tpu.memory_space<vmem>>, %arg10: memref<16x256xf32, #tpu.memory_space<vmem>>) attributes {dimension_semantics = [#tpu.dimension_semantics<parallel>], iteration_bounds = array<i64: 1>, scalar_prefetch = 0 : i64, scratch_operands = 0 : i64, tpu.core_type = #tpu.core_type<tc>, window_params = [{transform_indices = @transform_0, window_bounds = array<i64: 16, 8>}, {transform_indices = @transform_1, window_bounds = array<i64: 16, 4>}, {pipeline_mode = #tpu.pipeline_mode<synchronous>, transform_indices = @transform_2, window_bounds = array<i64: 8, 64>}, {pipeline_mode = #tpu.pipeline_mode<synchronous>, transform_indices = @transform_3, window_bounds = array<i64: 4, 64>}, {pipeline_mode = #tpu.pipeline_mode<synchronous>, transform_indices = @transform_4, window_bounds = array<i64: 1, 64>}, {pipeline_mode = #tpu.pipeline_mode<synchronous>, transform_indices = @transform_5, window_bounds = array<i64: 64, 64>}, {pipeline_mode = #tpu.pipeline_mode<synchronous>, transform_indices = @transform_6, window_bounds = array<i64: 1, 64>}, {pipeline_mode = #tpu.pipeline_mode<synchronous>, transform_indices = @transform_7, window_bounds = array<i64: 64, 256>}, {pipeline_mode = #tpu.pipeline_mode<synchronous>, transform_indices = @transform_8, window_bounds = array<i64: 1, 256>}, {transform_indices = @transform_9, window_bounds = array<i64: 16, 256>}]} {
    %c0 = arith.constant 0 : index
    %c0_0 = arith.constant 0 : index
    %0 = vector.load %arg1[%c0, %c0_0] : memref<16x8xbf16, #tpu.memory_space<vmem>>, vector<16x8xbf16>
    %c0_1 = arith.constant 0 : index
    %c0_2 = arith.constant 0 : index
    %1 = vector.load %arg2[%c0_1, %c0_2] : memref<16x4xbf16, #tpu.memory_space<vmem>>, vector<16x4xbf16>
    %c0_3 = arith.constant 0 : index
    %c0_4 = arith.constant 0 : index
    %2 = vector.load %arg3[%c0_3, %c0_4] : memref<8x64xbf16, #tpu.memory_space<vmem>>, vector<8x64xbf16>
    %cst = arith.constant dense<0.000000e+00> : vector<16x64xf32>
    %3 = tpu.matmul %0, %2, %cst {dimension_numbers = #tpu.dot_dimension_numbers<[1], [0], [0], [1], [0, 0, 1, 1], [], []>} : vector<16x8xbf16>, vector<8x64xbf16>, vector<16x64xf32> -> vector<16x64xf32>
    %c0_5 = arith.constant 0 : index
    %c0_6 = arith.constant 0 : index
    %4 = vector.load %arg4[%c0_5, %c0_6] : memref<4x64xbf16, #tpu.memory_space<vmem>>, vector<4x64xbf16>
    %cst_7 = arith.constant dense<0.000000e+00> : vector<16x64xf32>
    %5 = tpu.matmul %1, %4, %cst_7 {dimension_numbers = #tpu.dot_dimension_numbers<[1], [0], [0], [1], [0, 0, 1, 1], [], []>} : vector<16x4xbf16>, vector<4x64xbf16>, vector<16x64xf32> -> vector<16x64xf32>
    %6 = arith.addf %3, %5 : vector<16x64xf32>
    %c0_8 = arith.constant 0 : index
    %c0_9 = arith.constant 0 : index
    %7 = vector.load %arg5[%c0_8, %c0_9] : memref<1x64xf32, #tpu.memory_space<vmem>>, vector<1x64xf32>
    %8 = vector.broadcast %7 : vector<1x64xf32> to vector<16x64xf32>
    %9 = arith.addf %6, %8 : vector<16x64xf32>
    %cst_10 = arith.constant 0.000000e+00 : f32
    %10 = vector.broadcast %cst_10 : f32 to vector<16x64xf32>
    %11 = arith.maximumf %9, %10 : vector<16x64xf32>
    %12 = arith.truncf %11 : vector<16x64xf32> to vector<16x64xbf16>
    %c0_11 = arith.constant 0 : index
    %c0_12 = arith.constant 0 : index
    %13 = vector.load %arg6[%c0_11, %c0_12] : memref<64x64xbf16, #tpu.memory_space<vmem>>, vector<64x64xbf16>
    %cst_13 = arith.constant dense<0.000000e+00> : vector<16x64xf32>
    %14 = tpu.matmul %12, %13, %cst_13 {dimension_numbers = #tpu.dot_dimension_numbers<[1], [0], [0], [1], [0, 0, 1, 1], [], []>} : vector<16x64xbf16>, vector<64x64xbf16>, vector<16x64xf32> -> vector<16x64xf32>
    %c0_14 = arith.constant 0 : index
    %c0_15 = arith.constant 0 : index
    %15 = vector.load %arg7[%c0_14, %c0_15] : memref<1x64xf32, #tpu.memory_space<vmem>>, vector<1x64xf32>
    %16 = vector.broadcast %15 : vector<1x64xf32> to vector<16x64xf32>
    %17 = arith.addf %14, %16 : vector<16x64xf32>
    %cst_16 = arith.constant 0.000000e+00 : f32
    %18 = vector.broadcast %cst_16 : f32 to vector<16x64xf32>
    %19 = arith.maximumf %17, %18 : vector<16x64xf32>
    %20 = arith.truncf %19 : vector<16x64xf32> to vector<16x64xbf16>
    %c0_17 = arith.constant 0 : index
    %c0_18 = arith.constant 0 : index
    %21 = vector.load %arg8[%c0_17, %c0_18] : memref<64x256xbf16, #tpu.memory_space<vmem>>, vector<64x256xbf16>
    %cst_19 = arith.constant dense<0.000000e+00> : vector<16x256xf32>
    %22 = tpu.matmul %20, %21, %cst_19 {dimension_numbers = #tpu.dot_dimension_numbers<[1], [0], [0], [1], [0, 0, 1, 1], [], []>} : vector<16x64xbf16>, vector<64x256xbf16>, vector<16x256xf32> -> vector<16x256xf32>
    %c0_20 = arith.constant 0 : index
    %c0_21 = arith.constant 0 : index
    %23 = vector.load %arg9[%c0_20, %c0_21] : memref<1x256xf32, #tpu.memory_space<vmem>>, vector<1x256xf32>
    %24 = vector.broadcast %23 : vector<1x256xf32> to vector<16x256xf32>
    %25 = arith.addf %22, %24 : vector<16x256xf32>
    %c0_22 = arith.constant 0 : index
    %c0_23 = arith.constant 0 : index
    %26 = vector.load %arg10[%c0_22, %c0_23] : memref<16x256xf32, #tpu.memory_space<vmem>>, vector<16x256xf32>
    tpu.vector_store %arg10[%c0_22, %c0_23], %25 {strides = array<i32>} : memref<16x256xf32, #tpu.memory_space<vmem>>, vector<16x256xf32>,
    return
  }
  func.func @transform_0(%arg0: i32) -> (i32, i32) {
    %c0_i32 = arith.constant 0 : i32
    %c0_i32_0 = arith.constant 0 : i32
    return %arg0, %c0_i32 : i32, i32
  }
  func.func @transform_1(%arg0: i32) -> (i32, i32) {
    %c0_i32 = arith.constant 0 : i32
    %c0_i32_0 = arith.constant 0 : i32
    return %arg0, %c0_i32 : i32, i32
  }
  func.func @transform_2(%arg0: i32) -> (i32, i32) {
    %c0_i32 = arith.constant 0 : i32
    %c0_i32_0 = arith.constant 0 : i32
    %c0_i32_1 = arith.constant 0 : i32
    return %c0_i32, %c0_i32_0 : i32, i32
  }
  func.func @transform_3(%arg0: i32) -> (i32, i32) {
    %c0_i32 = arith.constant 0 : i32
    %c0_i32_0 = arith.constant 0 : i32
    %c0_i32_1 = arith.constant 0 : i32
    return %c0_i32, %c0_i32_0 : i32, i32
  }
  func.func @transform_4(%arg0: i32) -> (i32, i32) {
    %c0_i32 = arith.constant 0 : i32
    %c0_i32_0 = arith.constant 0 : i32
    %c0_i32_1 = arith.constant 0 : i32
    return %c0_i32, %c0_i32_0 : i32, i32
  }
  func.func @transform_5(%arg0: i32) -> (i32, i32) {
    %c0_i32 = arith.constant 0 : i32
    %c0_i32_0 = arith.constant 0 : i32
    %c0_i32_1 = arith.constant 0 : i32
    return %c0_i32, %c0_i32_0 : i32, i32
  }
  func.func @transform_6(%arg0: i32) -> (i32, i32) {
    %c0_i32 = arith.constant 0 : i32
    %c0_i32_0 = arith.constant 0 : i32
    %c0_i32_1 = arith.constant 0 : i32
    return %c0_i32, %c0_i32_0 : i32, i32
  }
  func.func @transform_7(%arg0: i32) -> (i32, i32) {
    %c0_i32 = arith.constant 0 : i32
    %c0_i32_0 = arith.constant 0 : i32
    %c0_i32_1 = arith.constant 0 : i32
    return %c0_i32, %c0_i32_0 : i32, i32
  }
  func.func @transform_8(%arg0: i32) -> (i32, i32) {
    %c0_i32 = arith.constant 0 : i32
    %c0_i32_0 = arith.constant 0 : i32
    %c0_i32_1 = arith.constant 0 : i32
    return %c0_i32, %c0_i32_0 : i32, i32
  }
  func.func @transform_9(%arg0: i32) -> (i32, i32) {
    %c0_i32 = arith.constant 0 : i32
    %c0_i32_0 = arith.constant 0 : i32
    return %arg0, %c0_i32 : i32, i32
  }
}

module attributes {stable_mosaic.version = 11 : i64} {
  func.func @_critic_kernel(%arg0: i32, %arg1: memref<16x8xbf16, #tpu.memory_space<vmem>>, %arg2: memref<16x4xbf16, #tpu.memory_space<vmem>>, %arg3: memref<8x64xbf16, #tpu.memory_space<vmem>>, %arg4: memref<4x64xbf16, #tpu.memory_space<vmem>>, %arg5: memref<1x64xf32, #tpu.memory_space<vmem>>, %arg6: memref<64x64xbf16, #tpu.memory_space<vmem>>, %arg7: memref<1x64xf32, #tpu.memory_space<vmem>>, %arg8: memref<64x256xbf16, #tpu.memory_space<vmem>>, %arg9: memref<1x256xf32, #tpu.memory_space<vmem>>, %arg10: memref<16x256xf32, #tpu.memory_space<vmem>>) attributes {dimension_semantics = [#tpu.dimension_semantics<parallel>], iteration_bounds = array<i64: 1>, scalar_prefetch = 0 : i64, scratch_operands = 0 : i64, tpu.core_type = #tpu.core_type<tc>, window_params = [{transform_indices = @transform_0, window_bounds = array<i64: 16, 8>}, {transform_indices = @transform_1, window_bounds = array<i64: 16, 4>}, {pipeline_mode = #tpu.pipeline_mode<synchronous>, transform_indices = @transform_2, window_bounds = array<i64: 8, 64>}, {pipeline_mode = #tpu.pipeline_mode<synchronous>, transform_indices = @transform_3, window_bounds = array<i64: 4, 64>}, {pipeline_mode = #tpu.pipeline_mode<synchronous>, transform_indices = @transform_4, window_bounds = array<i64: 1, 64>}, {pipeline_mode = #tpu.pipeline_mode<synchronous>, transform_indices = @transform_5, window_bounds = array<i64: 64, 64>}, {pipeline_mode = #tpu.pipeline_mode<synchronous>, transform_indices = @transform_6, window_bounds = array<i64: 1, 64>}, {pipeline_mode = #tpu.pipeline_mode<synchronous>, transform_indices = @transform_7, window_bounds = array<i64: 64, 256>}, {pipeline_mode = #tpu.pipeline_mode<synchronous>, transform_indices = @transform_8, window_bounds = array<i64: 1, 256>}, {transform_indices = @transform_9, window_bounds = array<i64: 16, 256>}]} {
    %c0 = arith.constant 0 : index
    %c0_0 = arith.constant 0 : index
    %0 = vector.load %arg1[%c0, %c0_0] : memref<16x8xbf16, #tpu.memory_space<vmem>>, vector<16x8xbf16>
    %c0_1 = arith.constant 0 : index
    %c0_2 = arith.constant 0 : index
    %1 = vector.load %arg2[%c0_1, %c0_2] : memref<16x4xbf16, #tpu.memory_space<vmem>>, vector<16x4xbf16>
    %c0_3 = arith.constant 0 : index
    %c0_4 = arith.constant 0 : index
    %2 = vector.load %arg3[%c0_3, %c0_4] : memref<8x64xbf16, #tpu.memory_space<vmem>>, vector<8x64xbf16>
    %cst = arith.constant dense<0.000000e+00> : vector<16x64xf32>
    %3 = tpu.matmul %0, %2, %cst {dimension_numbers = #tpu.dot_dimension_numbers<[1], [0], [0], [1], [0, 0, 1, 1], [], []>} : vector<16x8xbf16>, vector<8x64xbf16>, vector<16x64xf32> -> vector<16x64xf32>
    %c0_5 = arith.constant 0 : index
    %c0_6 = arith.constant 0 : index
    %4 = vector.load %arg4[%c0_5, %c0_6] : memref<4x64xbf16, #tpu.memory_space<vmem>>, vector<4x64xbf16>
    %cst_7 = arith.constant dense<0.000000e+00> : vector<16x64xf32>
    %5 = tpu.matmul %1, %4, %cst_7 {dimension_numbers = #tpu.dot_dimension_numbers<[1], [0], [0], [1], [0, 0, 1, 1], [], []>} : vector<16x4xbf16>, vector<4x64xbf16>, vector<16x64xf32> -> vector<16x64xf32>
    %6 = arith.addf %3, %5 : vector<16x64xf32>
    %c0_8 = arith.constant 0 : index
    %c0_9 = arith.constant 0 : index
    %7 = vector.load %arg5[%c0_8, %c0_9] : memref<1x64xf32, #tpu.memory_space<vmem>>, vector<1x64xf32>
    %8 = vector.broadcast %7 : vector<1x64xf32> to vector<16x64xf32>
    %9 = arith.addf %6, %8 : vector<16x64xf32>
    %cst_10 = arith.constant 0.000000e+00 : f32
    %10 = vector.broadcast %cst_10 : f32 to vector<16x64xf32>
    %11 = arith.maximumf %9, %10 : vector<16x64xf32>
    %12 = arith.truncf %11 : vector<16x64xf32> to vector<16x64xbf16>
    %c0_11 = arith.constant 0 : index
    %c0_12 = arith.constant 0 : index
    %13 = vector.load %arg6[%c0_11, %c0_12] : memref<64x64xbf16, #tpu.memory_space<vmem>>, vector<64x64xbf16>
    %cst_13 = arith.constant dense<0.000000e+00> : vector<16x64xf32>
    %14 = tpu.matmul %12, %13, %cst_13 {dimension_numbers = #tpu.dot_dimension_numbers<[1], [0], [0], [1], [0, 0, 1, 1], [], []>} : vector<16x64xbf16>, vector<64x64xbf16>, vector<16x64xf32> -> vector<16x64xf32>
    %c0_14 = arith.constant 0 : index
    %c0_15 = arith.constant 0 : index
    %15 = vector.load %arg7[%c0_14, %c0_15] : memref<1x64xf32, #tpu.memory_space<vmem>>, vector<1x64xf32>
    %16 = vector.broadcast %15 : vector<1x64xf32> to vector<16x64xf32>
    %17 = arith.addf %14, %16 : vector<16x64xf32>
    %cst_16 = arith.constant 0.000000e+00 : f32
    %18 = vector.broadcast %cst_16 : f32 to vector<16x64xf32>
    %19 = arith.maximumf %17, %18 : vector<16x64xf32>
    %20 = arith.truncf %19 : vector<16x64xf32> to vector<16x64xbf16>
    %c0_17 = arith.constant 0 : index
    %c0_18 = arith.constant 0 : index
    %21 = vector.load %arg8[%c0_17, %c0_18] : memref<64x256xbf16, #tpu.memory_space<vmem>>, vector<64x256xbf16>
    %cst_19 = arith.constant dense<0.000000e+00> : vector<16x256xf32>
    %22 = tpu.matmul %20, %21, %cst_19 {dimension_numbers = #tpu.dot_dimension_numbers<[1], [0], [0], [1], [0, 0, 1, 1], [], []>} : vector<16x64xbf16>, vector<64x256xbf16>, vector<16x256xf32> -> vector<16x256xf32>
    %c0_20 = arith.constant 0 : index
    %c0_21 = arith.constant 0 : index
    %23 = vector.load %arg9[%c0_20, %c0_21] : memref<1x256xf32, #tpu.memory_space<vmem>>, vector<1x256xf32>
    %24 = vector.broadcast %23 : vector<1x256xf32> to vector<16x256xf32>
    %25 = arith.addf %22, %24 : vector<16x256xf32>
    %c0_22 = arith.constant 0 : index
    %c0_23 = arith.constant 0 : index
    %26 = vector.load %arg10[%c0_22, %c0_23] : memref<16x256xf32, #tpu.memory_space<vmem>>, vector<16x256xf32>
    tpu.vector_store %arg10[%c0_22, %c0_23], %25 {strides = array<i32>} : memref<16x256xf32, #tpu.memory_space<vmem>>, vector<16x256xf32>,
    return
  }
  func.func @transform_0(%arg0: i32) -> (i32, i32) {
    %c0_i32 = arith.constant 0 : i32
    %c0_i32_0 = arith.constant 0 : i32
    return %arg0, %c0_i32 : i32, i32
  }
  func.func @transform_1(%arg0: i32) -> (i32, i32) {
    %c0_i32 = arith.constant 0 : i32
    %c0_i32_0 = arith.constant 0 : i32
    return %arg0, %c0_i32 : i32, i32
  }
  func.func @transform_2(%arg0: i32) -> (i32, i32) {
    %c0_i32 = arith.constant 0 : i32
    %c0_i32_0 = arith.constant 0 : i32
    %c0_i32_1 = arith.constant 0 : i32
    return %c0_i32, %c0_i32_0 : i32, i32
  }
  func.func @transform_3(%arg0: i32) -> (i32, i32) {
    %c0_i32 = arith.constant 0 : i32
    %c0_i32_0 = arith.constant 0 : i32
    %c0_i32_1 = arith.constant 0 : i32
    return %c0_i32, %c0_i32_0 : i32, i32
  }
  func.func @transform_4(%arg0: i32) -> (i32, i32) {
    %c0_i32 = arith.constant 0 : i32
    %c0_i32_0 = arith.constant 0 : i32
    %c0_i32_1 = arith.constant 0 : i32
    return %c0_i32, %c0_i32_0 : i32, i32
  }
  func.func @transform_5(%arg0: i32) -> (i32, i32) {
    %c0_i32 = arith.constant 0 : i32
    %c0_i32_0 = arith.constant 0 : i32
    %c0_i32_1 = arith.constant 0 : i32
    return %c0_i32, %c0_i32_0 : i32, i32
  }
  func.func @transform_6(%arg0: i32) -> (i32, i32) {
    %c0_i32 = arith.constant 0 : i32
    %c0_i32_0 = arith.constant 0 : i32
    %c0_i32_1 = arith.constant 0 : i32
    return %c0_i32, %c0_i32_0 : i32, i32
  }
  func.func @transform_7(%arg0: i32) -> (i32, i32) {
    %c0_i32 = arith.constant 0 : i32
    %c0_i32_0 = arith.constant 0 : i32
    %c0_i32_1 = arith.constant 0 : i32
    return %c0_i32, %c0_i32_0 : i32, i32
  }
  func.func @transform_8(%arg0: i32) -> (i32, i32) {
    %c0_i32 = arith.constant 0 : i32
    %c0_i32_0 = arith.constant 0 : i32
    %c0_i32_1 = arith.constant 0 : i32
    return %c0_i32, %c0_i32_0 : i32, i32
  }
  func.func @transform_9(%arg0: i32) -> (i32, i32) {
    %c0_i32 = arith.constant 0 : i32
    %c0_i32_0 = arith.constant 0 : i32
    return %arg0, %c0_i32 : i32, i32
  }
}

</mosaic_0001>

<bundles_post_ra>
// kernel: tpu_custom_call.1
= control target key start
LH: loop header
LB: loop body
LE: loop exit
PB: predicated region body
PF: predicated region fallthrough
CT: control target
= control target key end

     0   :  { %14 = vsyncpa [#allocation3], 0  ;;  %s692_s0 = inlined_call_operand.vmem [shape: bf16[16,8], index: 0, kind: input, shape index: {}]   ;;  %s693_s1 = inlined_call_operand.vmem [shape: bf16[16,4], index: 1, kind: input, shape index: {}]   ;;  %s694_s2 = inlined_call_operand.vmem [shape: bf16[8,64], index: 2, kind: input, shape index: {}]   ;;  %s695_s3 = inlined_call_operand.vmem [shape: bf16[4,64], index: 3, kind: input, shape index: {}]   ;;  %s696_s4 = inlined_call_operand.hbm [shape: f32[1,64], index: 4, kind: input, shape index: {}]   ;;  %s697_s5 = inlined_call_operand.vmem [shape: bf16[64,64], index: 5, kind: input, shape index: {}]   ;;  %s698_s6 = inlined_call_operand.vmem [shape: f32[1,64], index: 6, kind: input, shape index: {}]   ;;  %s699_s7 = inlined_call_operand.hbm [shape: bf16[64,256], index: 7, kind: input, shape index: {}]   ;;  %s700_s8 = inlined_call_operand.vmem [shape: f32[1,256], index: 8, kind: input, shape index: {}]   ;;  %s701_s9 = inlined_call_operand.hbm [shape: f32[16,256], index: 9, kind: output, shape index: {}]  }
   0x1   :  { %15 = vsyncpa [#allocation6], 0 }
   0x2   :  { %16 = vsyncpa [#allocation4], 0  ;;  %s554_s30 = smov [#allocation2]   ;;  %s555_s11 = smov [#allocation5]  }
   0x3   :  { %s31_s10 = sshll.u32 %s554_s30, 4  ;;  %s44_s12 = sshll.u32 %s555_s11, 4  ;;  %s32_s10 = int_to_ptr.vmem [resolvable:$true] %s31_s10  ;;  %s614_s12 = int_to_ptr.vmem [resolvable:$true] %s44_s12 }
   0x4   :  { %s482_s15 = scalar_lea.hbm %s696_s4, 16 }
   0x5   :  { %p483_p0 = scmp.ne.s32.totalorder %s696_s4, %s482_s15  ;;  %p486_p1 = scmp.lt.u32.totalorder %s482_s15, %s696_s4 }
   0x7   :  { %p488_p2 = pnand %p486_p1, %p483_p0 }
   0x9   :  { %491 = shalt.err (!%p488_p2)
}
   0xa   :  { %s492_s20 = scalar_lea.vmem %s32_s10, 16  ;;  %s496_s21 = scalar_lea.vmem %s32_s10, 32 }
   0xb   :  { %p493_p3 = scmp.ne.s32.totalorder %s32_s10, %s492_s20  ;;  %p497_p4 = scmp.lt.s32.totalorder %s32_s10, %s32_s10 }
   0xc   :  { %p498_p5 = scmp.lt.s32.totalorder %s496_s21, %s492_s20 }
   0xe   :  { %p499_p6 = por %p498_p5, %p497_p4 }
  0x10   :  { %p500_p7 = pnand %p499_p6, %p493_p3 }
  0x12   :  { %503 = shalt.err (!%p500_p7)
}
  0x13   :  { %34 = dma.hbm_to_vmem [thread:$0]  %s696_s4, 16, %s32_s10, [#allocation3]  }
  0x14   :  { %s504_s26 = scalar_lea.hbm %s699_s7, 1024 }
  0x15   :  { %p505_p8 = scmp.ne.s32.totalorder %s699_s7, %s504_s26  ;;  %p508_p9 = scmp.lt.u32.totalorder %s504_s26, %s699_s7 }
  0x17   :  { %p510_p10 = pnand %p508_p9, %p505_p8 }
  0x19   :  { %513 = shalt.err (!%p510_p10)
}
  0x1a   :  { %s514_s11 = scalar_lea.vmem %s614_s12, 1024  ;;  %p519_p12 = scmp.lt.s32.totalorder %s614_s12, %s614_s12 }
  0x1b   :  { %p515_p11 = scmp.ne.s32.totalorder %s614_s12, %s514_s11  ;;  %p520_p13 = scmp.lt.s32.totalorder %s514_s11, %s514_s11 }
  0x1d   :  { %p521_p0 = por %p520_p13, %p519_p12 }
  0x1f   :  { %p522_p1 = pnand %p521_p0, %p515_p11 }
  0x21   :  { %525 = shalt.err (!%p522_p1)
}
  0x22   :  { %s556_s4 = smov 128   ;;  %s557_s10 = smov 8  }
  0x23   :  { %50 = dma.hbm_to_vmem [thread:$0]  %s699_s7, 1024, %s614_s12, [#allocation6], %s556_s4, %s556_s4, %s557_s10  }
  0x24   :  { %548 = dma.done.wait [#allocation3], 16  }
  0x25   :  { %549 = vsyncadd [#allocation3], 4294967280 }
  0x26   :  { %550 = dma.done.wait [#allocation6], 1024  }
  0x27   :  { %551 = vsyncadd [#allocation6], 4294966272  ;;  %v558_v0 = vmov 0.0   ;;  %vm559_vm0 = vmmov 0   ;;  %vm75_vm1 = vcmask 1041408   ;;  %vm129_vm2 = vcmask 1043456  }
  0x28   :  { %430 = vmatprep.subr.bf16.mxu0 %v558_v0  ;;  %436 = vmatprep.subr.bf16.mxu1 %v558_v0  ;;  %vm71_vm3 = vcmask 31744   ;;  %vm125_vm4 = vcmask 64512   ;;  %v65_v1 = vld [vmem:[%s695_s3] sm:$0x3]  ;;  %v467_v8 = vld [vmem:[%s697_s5 + $0x8] sm:$0xff]   ;;  %v468_v9 = vld [vmem:[%s697_s5 + $0x10] sm:$0xff]   ;;  %v283_v46 = vlaneseq }
  0x29   :  { %432 = vmatprep.mubr.msk.bf16.mxu0 %vm559_vm0, %v558_v0  ;;  %438 = vmatprep.mubr.msk.bf16.mxu1 %vm559_vm0, %v558_v0  ;;  %v64_v2 = vld [vmem:[%s694_s2] sm:$0xf]  ;;  %v77_v3 = vsel %vm75_vm1, %v65_v1, 0  ;;  %v469_v10 = vld [vmem:[%s697_s5 + $0x18] sm:$0xff]   ;;  %v472_v12 = vld [vmem:[#allocation5 + $0x4] ss:$8 sps:$4 sm:$0xff]  }
  0x2a   :  { %v131_v4 = vsel %vm129_vm2, %v64_v2, 0  ;;  %v464_v5 = vld [vmem:[%s693_s1] sm:$0xff]   ;;  %431 = vmatpush3.bf16.msra.mxu0 %v77_v3  ;;  %v473_v14 = vld [vmem:[#allocation5 + $0x10] ss:$8 sps:$4 sm:$0xff]   ;;  %vm225_vm5 = vcmask 523264   ;;  %v560_v35 = vmov 0  }
  0x2b   :  { %v465_v6 = vld [vmem:[%s692_s0] sm:$0xff]   ;;  %437 = vmatpush3.bf16.msra.mxu1 %v131_v4  ;;  %442 = vmatprep.subr.bf16.mxu0 %v558_v0  ;;  %v479_v34 = vld [vmem:[#allocation5 + $0x30] ss:$8 sps:$4 sm:$0xff]   ;;  %v284_v47 = vshrl.u32 %v283_v46, 7 }
  0x2c   :  { %v466_v7 = vld [vmem:[%s697_s5] sm:$0xff]   ;;  %336 = vmatprep.subr.bf16.mxu1 %v472_v12 }
  0x2d   :  { %433 = vmatmul.mubr.msk.bf16.vlgmr.msra.gmra.mrb[0].mxu0 %vm71_vm3, %v464_v5  ;;  %v470_v11 = vld [vmem:[#allocation5] ss:$8 sps:$4 sm:$0xff]   ;;  %v475_v13 = vld [vmem:[#allocation5 + $0x14] ss:$8 sps:$4 sm:$0xff]   ;;  %v478_v31 = vld [vmem:[#allocation5 + $0x24] ss:$8 sps:$4 sm:$0xff]  }
  0x2e   :  { %439 = vmatmul.mubr.msk.bf16.vlgmr.msra.gmra.mrb[0].mxu1 %vm125_vm4, %v465_v6  ;;  %443 = vmatpush3.bf16.msra.mxu0 %v466_v7  ;;  %v405_v17 = vld [vmem:[#allocation2] ss:$0 sm:$0xff]  ;;  %v476_v32 = vld [vmem:[#allocation5 + $0x20] ss:$8 sps:$4 sm:$0xff]   ;;  %v285_v48 = vsub.s32 0, %v284_v47  ;;  %v289_v50 = vsub.s32 1, %v284_v47 }
  0x2f   :  { %450 = vmatprep.mubr.msk.bf16.mxu0 %vm559_vm0, %v558_v0  ;;  %444 = vmatprep.subr.bf16.mxu0 %v558_v0  ;;  %v481_v33 = vld [vmem:[#allocation5 + $0x34] ss:$8 sps:$4 sm:$0xff]  }
  0x30   :  { %337 = vmatpush1.bf16.msra.mxu1 %v470_v11  ;;  %368 = vmatprep.mubr.bf16.mxu1 %v560_v35  ;;  %v406_v36 = vld [vmem:[%s698_s6] ss:$0 sm:$0xff]  ;;  %s561_s6 = smov [#allocation7]  }
  0x31   :  { %338 = vmatprep.subr.bf16.mxu1 %v475_v13  ;;  %v281_v49 = vld [vmem:[%s700_s8] sm:$0x3]  ;;  %s388_s28 = sshll.u32 %s561_s6, 4  ;;  %s389_s28 = int_to_ptr.vmem [resolvable:$true] %s388_s28 }
  0x32   :  { %445 = vmatpush3.bf16.msra.mxu0 %v467_v8  ;;  %v286_v51 = vrot.slane %v281_v49, %v285_v48  ;;  %v290_v52 = vrot.slane %v281_v49, %v289_v50  ;;  %s526_s29 = scalar_lea.vmem %s389_s28, 512  ;;  %p531_p3 = scmp.lt.s32.totalorder %s389_s28, %s389_s28 }
  0x33   :  { %446 = vmatprep.subr.bf16.mxu0 %v558_v0  ;;  %p527_p2 = scmp.ne.s32.totalorder %s389_s28, %s526_s29  ;;  %p532_p4 = scmp.lt.s32.totalorder %s526_s29, %s526_s29 }
  0x34   :  { %339 = vmatpush1.bf16.msra.mxu1 %v473_v14 }
  0x35   :  { %340 = vmatprep.subr.bf16.mxu1 %v478_v31  ;;  %p533_p5 = por %p532_p4, %p531_p3 }
  0x36   :  { %447 = vmatpush3.bf16.msra.mxu0 %v468_v9 }
  0x37   :  { %448 = vmatprep.subr.bf16.mxu0 %v558_v0  ;;  %p534_p6 = pnand %p533_p5, %p527_p2 }
  0x38   :  { %341 = vmatpush1.bf16.msra.mxu1 %v476_v32 }
  0x39   :  { %342 = vmatprep.subr.bf16.mxu1 %v481_v33 }
  0x3a   :  { %449 = vmatpush3.bf16.msra.mxu0 %v469_v10 }
  0x3c   :  { %343 = vmatpush1.bf16.msra.mxu1 %v479_v34 }
 0x100   :  { %v113_v15 = vpop.f32.mrb[0].mxu0 }
 0x101   :  { %v167_v16 = vpop.f32.mrb[0].mxu1  ;;  %v434_v19 = vpop.f32.mrb[1].mxu0 }
 0x102   :  { %v168_v18 = vadd.f32 %v167_v16, %v113_v15  ;;  %v440_v20 = vpop.f32.mrb[1].mxu1  ;;  %v116_v21 = vpop.f32.mrb[2].mxu0 }
 0x103   :  { %v170_v22 = vpop.f32.mrb[2].mxu1  ;;  %v435_v25 = vpop.f32.mrb[3].mxu0 }
 0x104   :  { %v181_v23 = vadd.f32 %v405_v17, %v168_v18  ;;  %v171_v24 = vadd.f32 %v170_v22, %v116_v21  ;;  %v441_v26 = vpop.f32.mrb[3].mxu1 }
 0x106   :  { %v182_v27 = vadd.f32 %v405_v17, %v171_v24  ;;  %v183_v28 = vmax.f32 %v181_v23, 0.0 }
 0x108   :  { %v184_v29 = vmax.f32 %v182_v27, 0.0 }
 0x10a   :  { %v185_v30 = vpack.c.bf16 %v184_v29, %v183_v28 }
 0x10c   :  { %451 = vmatmul.mubr.msk.bf16.vlgmr.msra.gmra.mrb[4].mxu0 %vm225_vm5, %v185_v30 }
 0x1df   :  { %v263_v37 = vpop.f32.mrb[4].mxu0 }
 0x1e0   :  { %v264_v38 = vadd.f32 %v406_v36, %v263_v37  ;;  %v452_v39 = vpop.f32.mrb[5].mxu0 }
 0x1e1   :  { %v266_v40 = vpop.f32.mrb[6].mxu0 }
 0x1e2   :  { %v267_v41 = vadd.f32 %v406_v36, %v266_v40  ;;  %v453_v42 = vpop.f32.mrb[7].mxu0  ;;  %v270_v43 = vmax.f32 %v264_v38, 0.0 }
 0x1e4   :  { %v271_v44 = vmax.f32 %v267_v41, 0.0 }
 0x1e6   :  { %v272_v45 = vpack.c.bf16 %v271_v44, %v270_v43 }
 0x1e8   :  { %420 = vmatmul.mubr.msk.bf16.vlgmr.msra.gmra.mrb[4].mxu1 %vm225_vm5, %v272_v45 }
 0x2bb   :  { %v370_v53 = vpop.f32.mrb[4].mxu1 }
 0x2bc   :  { %v371_v54 = vadd.f32 %v370_v53, %v286_v51  ;;  %v372_v55 = vpop.f32.mrb[5].mxu1 }
 0x2bd   :  { %v373_v56 = vadd.f32 %v372_v55, %v290_v52  ;;  %v374_v57 = vpop.f32.mrb[6].mxu1 }
 0x2be   :  { %379 = vst [vmem:[#allocation7] sm:$0xff] %v371_v54  ;;  %v375_v58 = vadd.f32 %v374_v57, %v286_v51  ;;  %v376_v59 = vpop.f32.mrb[7].mxu1 }
 0x2bf   :  { %380 = vst [vmem:[#allocation7 + $0x8] sm:$0xff] %v373_v56  ;;  %v377_v60 = vadd.f32 %v376_v59, %v290_v52 }
 0x2c0   :  { %381 = vst [vmem:[#allocation7 + $0x10] sm:$0xff] %v375_v58 }
 0x2c1   :  { %382 = vst [vmem:[#allocation7 + $0x18] sm:$0xff] %v377_v60 }
 0x2c2   :  { %537 = shalt.err (!%p534_p6)
}
 0x2c3   :  { %s538_s11 = scalar_lea.hbm %s701_s9, 512 }
 0x2c4   :  { %p539_p7 = scmp.ne.s32.totalorder %s701_s9, %s538_s11  ;;  %p542_p8 = scmp.lt.u32.totalorder %s538_s11, %s701_s9 }
 0x2c6   :  { %p544_p9 = pnand %p542_p8, %p539_p7 }
 0x2c8   :  { %547 = shalt.err (!%p544_p9)
}
 0x2c9   :  { %s562_s15 = smov 256   ;;  %s563_s16 = smov 16  }
 0x2ca   :  { %394 = dma.vmem_to_hbm [thread:$0]  %s389_s28, 512, %s701_s9, [#allocation4], %s562_s15, %s562_s15, %s563_s16  }
 0x2cb   :  { %552 = dma.done.wait [#allocation4], 512  }
 0x2cc   :  { %553 = vsyncadd [#allocation4], 4294966784 }
 0x2cd   :  { %398 = vsyncpa [#allocation3], 1 }
 0x2ce   :  { %399 = vsyncpa [#allocation6], 1 }
 0x2cf   :  { %400 = vsyncpa [#allocation4], 1 }

// kernel: tpu_custom_call.1
= control target key start
LH: loop header
LB: loop body
LE: loop exit
PB: predicated region body
PF: predicated region fallthrough
CT: control target
= control target key end

     0   :  { %14 = vsyncpa [#allocation3], 0  ;;  %s692_s0 = inlined_call_operand.vmem [shape: bf16[16,8], index: 0, kind: input, shape index: {}]   ;;  %s693_s1 = inlined_call_operand.vmem [shape: bf16[16,4], index: 1, kind: input, shape index: {}]   ;;  %s694_s2 = inlined_call_operand.vmem [shape: bf16[8,64], index: 2, kind: input, shape index: {}]   ;;  %s695_s3 = inlined_call_operand.vmem [shape: bf16[4,64], index: 3, kind: input, shape index: {}]   ;;  %s696_s4 = inlined_call_operand.hbm [shape: f32[1,64], index: 4, kind: input, shape index: {}]   ;;  %s697_s5 = inlined_call_operand.vmem [shape: bf16[64,64], index: 5, kind: input, shape index: {}]   ;;  %s698_s6 = inlined_call_operand.vmem [shape: f32[1,64], index: 6, kind: input, shape index: {}]   ;;  %s699_s7 = inlined_call_operand.hbm [shape: bf16[64,256], index: 7, kind: input, shape index: {}]   ;;  %s700_s8 = inlined_call_operand.vmem [shape: f32[1,256], index: 8, kind: input, shape index: {}]   ;;  %s701_s9 = inlined_call_operand.hbm [shape: f32[16,256], index: 9, kind: output, shape index: {}]  }
   0x1   :  { %15 = vsyncpa [#allocation6], 0 }
   0x2   :  { %16 = vsyncpa [#allocation4], 0  ;;  %s554_s30 = smov [#allocation2]   ;;  %s555_s11 = smov [#allocation5]  }
   0x3   :  { %s31_s10 = sshll.u32 %s554_s30, 4  ;;  %s44_s12 = sshll.u32 %s555_s11, 4  ;;  %s32_s10 = int_to_ptr.vmem [resolvable:$true] %s31_s10  ;;  %s614_s12 = int_to_ptr.vmem [resolvable:$true] %s44_s12 }
   0x4   :  { %s482_s15 = scalar_lea.hbm %s696_s4, 16 }
   0x5   :  { %p483_p0 = scmp.ne.s32.totalorder %s696_s4, %s482_s15  ;;  %p486_p1 = scmp.lt.u32.totalorder %s482_s15, %s696_s4 }
   0x7   :  { %p488_p2 = pnand %p486_p1, %p483_p0 }
   0x9   :  { %491 = shalt.err (!%p488_p2)
}
   0xa   :  { %s492_s20 = scalar_lea.vmem %s32_s10, 16  ;;  %s496_s21 = scalar_lea.vmem %s32_s10, 32 }
   0xb   :  { %p493_p3 = scmp.ne.s32.totalorder %s32_s10, %s492_s20  ;;  %p497_p4 = scmp.lt.s32.totalorder %s32_s10, %s32_s10 }
   0xc   :  { %p498_p5 = scmp.lt.s32.totalorder %s496_s21, %s492_s20 }
   0xe   :  { %p499_p6 = por %p498_p5, %p497_p4 }
  0x10   :  { %p500_p7 = pnand %p499_p6, %p493_p3 }
  0x12   :  { %503 = shalt.err (!%p500_p7)
}
  0x13   :  { %34 = dma.hbm_to_vmem [thread:$0]  %s696_s4, 16, %s32_s10, [#allocation3]  }
  0x14   :  { %s504_s26 = scalar_lea.hbm %s699_s7, 1024 }
  0x15   :  { %p505_p8 = scmp.ne.s32.totalorder %s699_s7, %s504_s26  ;;  %p508_p9 = scmp.lt.u32.totalorder %s504_s26, %s699_s7 }
  0x17   :  { %p510_p10 = pnand %p508_p9, %p505_p8 }
  0x19   :  { %513 = shalt.err (!%p510_p10)
}
  0x1a   :  { %s514_s11 = scalar_lea.vmem %s614_s12, 1024  ;;  %p519_p12 = scmp.lt.s32.totalorder %s614_s12, %s614_s12 }
  0x1b   :  { %p515_p11 = scmp.ne.s32.totalorder %s614_s12, %s514_s11  ;;  %p520_p13 = scmp.lt.s32.totalorder %s514_s11, %s514_s11 }
  0x1d   :  { %p521_p0 = por %p520_p13, %p519_p12 }
  0x1f   :  { %p522_p1 = pnand %p521_p0, %p515_p11 }
  0x21   :  { %525 = shalt.err (!%p522_p1)
}
  0x22   :  { %s556_s4 = smov 128   ;;  %s557_s10 = smov 8  }
  0x23   :  { %50 = dma.hbm_to_vmem [thread:$0]  %s699_s7, 1024, %s614_s12, [#allocation6], %s556_s4, %s556_s4, %s557_s10  }
  0x24   :  { %548 = dma.done.wait [#allocation3], 16  }
  0x25   :  { %549 = vsyncadd [#allocation3], 4294967280 }
  0x26   :  { %550 = dma.done.wait [#allocation6], 1024  }
  0x27   :  { %551 = vsyncadd [#allocation6], 4294966272  ;;  %v558_v0 = vmov 0.0   ;;  %vm559_vm0 = vmmov 0   ;;  %vm75_vm1 = vcmask 1041408   ;;  %vm129_vm2 = vcmask 1043456  }
  0x28   :  { %430 = vmatprep.subr.bf16.mxu0 %v558_v0  ;;  %436 = vmatprep.subr.bf16.mxu1 %v558_v0  ;;  %vm71_vm3 = vcmask 31744   ;;  %vm125_vm4 = vcmask 64512   ;;  %v65_v1 = vld [vmem:[%s695_s3] sm:$0x3]  ;;  %v467_v8 = vld [vmem:[%s697_s5 + $0x8] sm:$0xff]   ;;  %v468_v9 = vld [vmem:[%s697_s5 + $0x10] sm:$0xff]   ;;  %v283_v46 = vlaneseq }
  0x29   :  { %432 = vmatprep.mubr.msk.bf16.mxu0 %vm559_vm0, %v558_v0  ;;  %438 = vmatprep.mubr.msk.bf16.mxu1 %vm559_vm0, %v558_v0  ;;  %v64_v2 = vld [vmem:[%s694_s2] sm:$0xf]  ;;  %v77_v3 = vsel %vm75_vm1, %v65_v1, 0  ;;  %v469_v10 = vld [vmem:[%s697_s5 + $0x18] sm:$0xff]   ;;  %v472_v12 = vld [vmem:[#allocation5 + $0x4] ss:$8 sps:$4 sm:$0xff]  }
  0x2a   :  { %v131_v4 = vsel %vm129_vm2, %v64_v2, 0  ;;  %v464_v5 = vld [vmem:[%s693_s1] sm:$0xff]   ;;  %431 = vmatpush3.bf16.msra.mxu0 %v77_v3  ;;  %v473_v14 = vld [vmem:[#allocation5 + $0x10] ss:$8 sps:$4 sm:$0xff]   ;;  %vm225_vm5 = vcmask 523264   ;;  %v560_v35 = vmov 0  }
  0x2b   :  { %v465_v6 = vld [vmem:[%s692_s0] sm:$0xff]   ;;  %437 = vmatpush3.bf16.msra.mxu1 %v131_v4  ;;  %442 = vmatprep.subr.bf16.mxu0 %v558_v0  ;;  %v479_v34 = vld [vmem:[#allocation5 + $0x30] ss:$8 sps:$4 sm:$0xff]   ;;  %v284_v47 = vshrl.u32 %v283_v46, 7 }
  0x2c   :  { %v466_v7 = vld [vmem:[%s697_s5] sm:$0xff]   ;;  %336 = vmatprep.subr.bf16.mxu1 %v472_v12 }
  0x2d   :  { %433 = vmatmul.mubr.msk.bf16.vlgmr.msra.gmra.mrb[0].mxu0 %vm71_vm3, %v464_v5  ;;  %v470_v11 = vld [vmem:[#allocation5] ss:$8 sps:$4 sm:$0xff]   ;;  %v475_v13 = vld [vmem:[#allocation5 + $0x14] ss:$8 sps:$4 sm:$0xff]   ;;  %v478_v31 = vld [vmem:[#allocation5 + $0x24] ss:$8 sps:$4 sm:$0xff]  }
  0x2e   :  { %439 = vmatmul.mubr.msk.bf16.vlgmr.msra.gmra.mrb[0].mxu1 %vm125_vm4, %v465_v6  ;;  %443 = vmatpush3.bf16.msra.mxu0 %v466_v7  ;;  %v405_v17 = vld [vmem:[#allocation2] ss:$0 sm:$0xff]  ;;  %v476_v32 = vld [vmem:[#allocation5 + $0x20] ss:$8 sps:$4 sm:$0xff]   ;;  %v285_v48 = vsub.s32 0, %v284_v47  ;;  %v289_v50 = vsub.s32 1, %v284_v47 }
  0x2f   :  { %450 = vmatprep.mubr.msk.bf16.mxu0 %vm559_vm0, %v558_v0  ;;  %444 = vmatprep.subr.bf16.mxu0 %v558_v0  ;;  %v481_v33 = vld [vmem:[#allocation5 + $0x34] ss:$8 sps:$4 sm:$0xff]  }
  0x30   :  { %337 = vmatpush1.bf16.msra.mxu1 %v470_v11  ;;  %368 = vmatprep.mubr.bf16.mxu1 %v560_v35  ;;  %v406_v36 = vld [vmem:[%s698_s6] ss:$0 sm:$0xff]  ;;  %s561_s6 = smov [#allocation7]  }
  0x31   :  { %338 = vmatprep.subr.bf16.mxu1 %v475_v13  ;;  %v281_v49 = vld [vmem:[%s700_s8] sm:$0x3]  ;;  %s388_s28 = sshll.u32 %s561_s6, 4  ;;  %s389_s28 = int_to_ptr.vmem [resolvable:$true] %s388_s28 }
  0x32   :  { %445 = vmatpush3.bf16.msra.mxu0 %v467_v8  ;;  %v286_v51 = vrot.slane %v281_v49, %v285_v48  ;;  %v290_v52 = vrot.slane %v281_v49, %v289_v50  ;;  %s526_s29 = scalar_lea.vmem %s389_s28, 512  ;;  %p531_p3 = scmp.lt.s32.totalorder %s389_s28, %s389_s28 }
  0x33   :  { %446 = vmatprep.subr.bf16.mxu0 %v558_v0  ;;  %p527_p2 = scmp.ne.s32.totalorder %s389_s28, %s526_s29  ;;  %p532_p4 = scmp.lt.s32.totalorder %s526_s29, %s526_s29 }
  0x34   :  { %339 = vmatpush1.bf16.msra.mxu1 %v473_v14 }
  0x35   :  { %340 = vmatprep.subr.bf16.mxu1 %v478_v31  ;;  %p533_p5 = por %p532_p4, %p531_p3 }
  0x36   :  { %447 = vmatpush3.bf16.msra.mxu0 %v468_v9 }
  0x37   :  { %448 = vmatprep.subr.bf16.mxu0 %v558_v0  ;;  %p534_p6 = pnand %p533_p5, %p527_p2 }
  0x38   :  { %341 = vmatpush1.bf16.msra.mxu1 %v476_v32 }
  0x39   :  { %342 = vmatprep.subr.bf16.mxu1 %v481_v33 }
  0x3a   :  { %449 = vmatpush3.bf16.msra.mxu0 %v469_v10 }
  0x3c   :  { %343 = vmatpush1.bf16.msra.mxu1 %v479_v34 }
 0x100   :  { %v113_v15 = vpop.f32.mrb[0].mxu0 }
 0x101   :  { %v167_v16 = vpop.f32.mrb[0].mxu1  ;;  %v434_v19 = vpop.f32.mrb[1].mxu0 }
 0x102   :  { %v168_v18 = vadd.f32 %v167_v16, %v113_v15  ;;  %v440_v20 = vpop.f32.mrb[1].mxu1  ;;  %v116_v21 = vpop.f32.mrb[2].mxu0 }
 0x103   :  { %v170_v22 = vpop.f32.mrb[2].mxu1  ;;  %v435_v25 = vpop.f32.mrb[3].mxu0 }
 0x104   :  { %v181_v23 = vadd.f32 %v405_v17, %v168_v18  ;;  %v171_v24 = vadd.f32 %v170_v22, %v116_v21  ;;  %v441_v26 = vpop.f32.mrb[3].mxu1 }
 0x106   :  { %v182_v27 = vadd.f32 %v405_v17, %v171_v24  ;;  %v183_v28 = vmax.f32 %v181_v23, 0.0 }
 0x108   :  { %v184_v29 = vmax.f32 %v182_v27, 0.0 }
 0x10a   :  { %v185_v30 = vpack.c.bf16 %v184_v29, %v183_v28 }
 0x10c   :  { %451 = vmatmul.mubr.msk.bf16.vlgmr.msra.gmra.mrb[4].mxu0 %vm225_vm5, %v185_v30 }
 0x1df   :  { %v263_v37 = vpop.f32.mrb[4].mxu0 }
 0x1e0   :  { %v264_v38 = vadd.f32 %v406_v36, %v263_v37  ;;  %v452_v39 = vpop.f32.mrb[5].mxu0 }
 0x1e1   :  { %v266_v40 = vpop.f32.mrb[6].mxu0 }
 0x1e2   :  { %v267_v41 = vadd.f32 %v406_v36, %v266_v40  ;;  %v453_v42 = vpop.f32.mrb[7].mxu0  ;;  %v270_v43 = vmax.f32 %v264_v38, 0.0 }
 0x1e4   :  { %v271_v44 = vmax.f32 %v267_v41, 0.0 }
 0x1e6   :  { %v272_v45 = vpack.c.bf16 %v271_v44, %v270_v43 }
 0x1e8   :  { %420 = vmatmul.mubr.msk.bf16.vlgmr.msra.gmra.mrb[4].mxu1 %vm225_vm5, %v272_v45 }
 0x2bb   :  { %v370_v53 = vpop.f32.mrb[4].mxu1 }
 0x2bc   :  { %v371_v54 = vadd.f32 %v370_v53, %v286_v51  ;;  %v372_v55 = vpop.f32.mrb[5].mxu1 }
 0x2bd   :  { %v373_v56 = vadd.f32 %v372_v55, %v290_v52  ;;  %v374_v57 = vpop.f32.mrb[6].mxu1 }
 0x2be   :  { %379 = vst [vmem:[#allocation7] sm:$0xff] %v371_v54  ;;  %v375_v58 = vadd.f32 %v374_v57, %v286_v51  ;;  %v376_v59 = vpop.f32.mrb[7].mxu1 }
 0x2bf   :  { %380 = vst [vmem:[#allocation7 + $0x8] sm:$0xff] %v373_v56  ;;  %v377_v60 = vadd.f32 %v376_v59, %v290_v52 }
 0x2c0   :  { %381 = vst [vmem:[#allocation7 + $0x10] sm:$0xff] %v375_v58 }
 0x2c1   :  { %382 = vst [vmem:[#allocation7 + $0x18] sm:$0xff] %v377_v60 }
 0x2c2   :  { %537 = shalt.err (!%p534_p6)
}
 0x2c3   :  { %s538_s11 = scalar_lea.hbm %s701_s9, 512 }
 0x2c4   :  { %p539_p7 = scmp.ne.s32.totalorder %s701_s9, %s538_s11  ;;  %p542_p8 = scmp.lt.u32.totalorder %s538_s11, %s701_s9 }
 0x2c6   :  { %p544_p9 = pnand %p542_p8, %p539_p7 }
 0x2c8   :  { %547 = shalt.err (!%p544_p9)
}
 0x2c9   :  { %s562_s15 = smov 256   ;;  %s563_s16 = smov 16  }
 0x2ca   :  { %394 = dma.vmem_to_hbm [thread:$0]  %s389_s28, 512, %s701_s9, [#allocation4], %s562_s15, %s562_s15, %s563_s16  }
 0x2cb   :  { %552 = dma.done.wait [#allocation4], 512  }
 0x2cc   :  { %553 = vsyncadd [#allocation4], 4294966784 }
 0x2cd   :  { %398 = vsyncpa [#allocation3], 1 }
 0x2ce   :  { %399 = vsyncpa [#allocation6], 1 }
 0x2cf   :  { %400 = vsyncpa [#allocation4], 1 }

</bundles_post_ra>
